<compile_context>
chip_gen: v6e
topology: v6e:2x2x1
jax: 0.10.0
libtpu: 0.0.40
codegen_flags: <defaults>
</compile_context>

<pallas_src>
import functools

import jax
import jax.numpy as jnp
from jax.experimental import pallas as pl
from jax.experimental.pallas import tpu as pltpu

LANES = 128
SUBLANES = 8
CHUNK_ROWS = 512                 # in-kernel compute chunk (bounds VPU working set)
MAX_TILE_ROWS = 16384            # absolute cap on per-block rows
TILE_VMEM_BUDGET = 24 << 20      # double-buffered input tiles (3 inputs x 2 bufs)
VMEM_LIMIT_BYTES = 32 << 20      # > v5e 16 MiB default, < v7x 64 MiB physical


def _round_up(x, m):
    return ((x + m - 1) // m) * m


def _tile_vmem_budget_bytes():
    """Double-buffered input-tile byte budget, derived from the chip's VMEM."""
    cap = 128 << 20
    try:
        cap = int(pltpu.get_tpu_info().vmem_capacity_bytes)
    except Exception:
        pass
    # Keep tiles comfortably under the scoped limit with headroom for output
    # buffers and compiler-internal scratch (v7x: 64 MiB -> 24 MiB budget).
    return max(4 << 20, min(TILE_VMEM_BUDGET, cap // 2 - (8 << 20)))


def _num_tensorcores():
    """TensorCores per chip: 2 on v7x, 1 on v5e/v6e.  Defaults to 1 if unknown."""
    try:
        info = pltpu.get_tpu_info()
        for attr in ("num_tensorcores", "tensorcore_count"):
            v = getattr(info, attr, None)
            if isinstance(v, int) and 1 <= v <= 4:
                return v
    except Exception:
        pass
    try:
        kind = jax.devices()[0].device_kind.lower()
        if "v7" in kind:
            return 2
    except Exception:
        pass
    return 1


def _accum_chunk(pred_ref, targ_ref, mask_ref, err_ref, msk_ref,
                 start, ch_rows, rem):
    """Accumulate one (ch_rows, 128) chunk into the (8,128) output partials."""
    s = pl.ds(start, ch_rows)
    p = pred_ref[s, :].astype(jnp.float32)
    t = targ_ref[s, :].astype(jnp.float32)
    m = mask_ref[s, :].astype(jnp.float32)
    d = p - t
    e = d * d * m
    if rem is not None:
        # Rows at/after `rem` are past the true end of the data (partial
        # boundary block): select them away (jnp.where is NaN-safe).
        row_ids = jax.lax.broadcasted_iota(jnp.int32, (ch_rows, LANES), 0)
        valid = row_ids < rem
        e = jnp.where(valid, e, 0.0)
        m = jnp.where(valid, m, 0.0)
    # Sublane-group sum: pure VPU adds, no per-chunk cross-lane XLU work.
    err_ref[...] += e.reshape(-1, SUBLANES, LANES).sum(axis=0)
    msk_ref[...] += m.reshape(-1, SUBLANES, LANES).sum(axis=0)


def _masked_mse_kernel(pred_ref, targ_ref, mask_ref, err_ref, msk_ref, *,
                       rows, tile_rows, chunk_rows, blocks_per_split,
                       has_partial_tail):
    c = pl.program_id(0)   # parallel split (TensorCore) axis
    k = pl.program_id(1)   # streaming / reduction axis

    @pl.when(k == 0)
    def _init():
        # Output blocks are grid-resident across k (constant block index), so
        # they double as accumulators; only written back when `c` changes.
        err_ref[...] = jnp.zeros_like(err_ref)
        msk_ref[...] = jnp.zeros_like(msk_ref)

    n_chunks = tile_rows // chunk_rows
    tail_rows = tile_rows - n_chunks * chunk_rows        # static, multiple of 8

    def sweep(rem_tile=None):
        if n_chunks > 0:
            def body(i, carry):
                start = pl.multiple_of(i * chunk_rows, chunk_rows)
                rem = None if rem_tile is None else rem_tile - i * chunk_rows
                _accum_chunk(pred_ref, targ_ref, mask_ref, err_ref, msk_ref,
                             start, chunk_rows, rem)
                return carry
            jax.lax.fori_loop(0, n_chunks, body, 0)
        if tail_rows > 0:
            start = n_chunks * chunk_rows
            rem = None if rem_tile is None else rem_tile - start
            _accum_chunk(pred_ref, targ_ref, mask_ref, err_ref, msk_ref,
                         start, tail_rows, rem)

    if not has_partial_tail:
        sweep()
    else:
        tile_start = (c * blocks_per_split + k) * tile_rows
        rem_tile = rows - tile_start

        @pl.when(rem_tile >= tile_rows)     # interior blocks: mask-free path
        def _full():
            sweep()

        @pl.when(rem_tile < tile_rows)      # the single partial boundary block
        def _partial():
            sweep(rem_tile)


def masked_mse_loss(pred, target, mask, *, _max_tile_rows=None,
                    _force_num_splits=None):
    """sum((pred - target)**2 * mask) / max(sum(mask), 1) — MaskedMSELoss.forward."""
    assert pred.shape == target.shape == mask.shape
    n = pred.size

    def as_lane_slab(x):
        x = jnp.ravel(x)
        if n % LANES != 0:
            # TODO(synk): ragged lane tail — minimal pad to lane width only
            # (padded mask is zero, so semantics are preserved); lane-aligned
            # shapes take the zero-copy reshape path.
            x = jnp.pad(x, (0, LANES - n % LANES))
        return x.reshape(-1, LANES)

    p2 = as_lane_slab(pred)
    t2 = as_lane_slab(target)
    m2 = as_lane_slab(mask)
    rows = p2.shape[0]

    # --- tile sizing: dtype- and VMEM-aware ---------------------------------
    itemsize_total = (p2.dtype.itemsize + t2.dtype.itemsize + m2.dtype.itemsize)
    cap = _tile_vmem_budget_bytes() // (2 * LANES * itemsize_total)
    cap = max(SUBLANES, min(MAX_TILE_ROWS, (cap // SUBLANES) * SUBLANES))
    if _max_tile_rows is not None:
        cap = max(SUBLANES, min(cap, _round_up(int(_max_tile_rows), SUBLANES)))

    tile_rows = min(cap, _round_up(rows, SUBLANES))
    k_total = pl.cdiv(rows, tile_rows)

    # --- TensorCore-aware split (even, no overflow blocks) ------------------
    hw_splits = _num_tensorcores() if _force_num_splits is None else int(_force_num_splits)
    num_splits = max(1, min(hw_splits, k_total))
    blocks_per_split = k_total
    if num_splits > 1:
        bps = pl.cdiv(k_total, num_splits)
        grid_blocks = num_splits * bps
        t_even = max(SUBLANES, _round_up(pl.cdiv(rows, grid_blocks), SUBLANES))
        if pl.cdiv(rows, t_even) == grid_blocks:
            tile_rows, k_total, blocks_per_split = t_even, grid_blocks, bps
        else:
            num_splits = 1      # no even whole-tile split exists: serial stream

    has_partial_tail = (rows % tile_rows) != 0

    in_spec = pl.BlockSpec((tile_rows, LANES),
                           lambda c, k: (c * blocks_per_split + k, 0))
    out_spec = pl.BlockSpec((SUBLANES, LANES), lambda c, k: (c, 0))
    part_shape = jax.ShapeDtypeStruct((num_splits * SUBLANES, LANES), jnp.float32)

    kernel = functools.partial(
        _masked_mse_kernel,
        rows=rows,
        tile_rows=tile_rows,
        chunk_rows=CHUNK_ROWS,
        blocks_per_split=blocks_per_split,
        has_partial_tail=has_partial_tail,
    )

    err_part, msk_part = pl.pallas_call(
        kernel,
        out_shape=(part_shape, part_shape),
        grid_spec=pltpu.PrefetchScalarGridSpec(
            num_scalar_prefetch=0,
            grid=(num_splits, blocks_per_split),
            in_specs=[in_spec, in_spec, in_spec],
            out_specs=(out_spec, out_spec),
        ),
        compiler_params=pltpu.CompilerParams(
            # "parallel" shards the split axis across TensorCores on v7x; on
            # 1-TC chips num_splits==1 so the axis is a no-op.
            dimension_semantics=("parallel", "arbitrary"),
            vmem_limit_bytes=VMEM_LIMIT_BYTES,
        ),
    )(p2, t2, m2)

    total_err = jnp.sum(err_part)
    valid_px = jnp.maximum(jnp.sum(msk_part), jnp.float32(1.0))   # .clamp(min=1)
    return total_err / valid_px


if __name__ == "__main__":
    key = jax.random.PRNGKey(0)
    k1, k2, k3 = jax.random.split(key, 3)

    def ref_loss(p, t, m):
        p32, t32, m32 = (x.astype(jnp.float32) for x in (p, t, m))
        return ((p32 - t32) ** 2 * m32).sum() / jnp.maximum(m32.sum(), 1.0)

    loss_fn = jax.jit(masked_mse_loss)

    # 1) Small NCHW inputs, consistent with a depth-prediction style use.
    shape = (2, 4, 16, 16)
    pred = jax.random.normal(k1, shape, dtype=jnp.float32)
    target = jax.random.normal(k2, shape, dtype=jnp.float32)
    mask = (jax.random.uniform(k3, shape) > 0.5).astype(jnp.float32)
    loss = jax.block_until_ready(loss_fn(pred, target, mask))
    assert jnp.allclose(loss, ref_loss(pred, target, mask), rtol=1e-5, atol=1e-6)

    # 2) Narrow-dtype streaming: bf16 pred/target/mask cast to f32 on the tile.
    pred_bf, targ_bf, mask_bf = (x.astype(jnp.bfloat16) for x in (pred, target, mask))
    loss_bf = jax.block_until_ready(loss_fn(pred_bf, targ_bf, mask_bf))
    assert jnp.allclose(loss_bf, ref_loss(pred_bf, targ_bf, mask_bf),
                        rtol=1e-5, atol=1e-6)

    # 3) Partial boundary block (row count not a multiple of the 8-row group).
    shape2 = (2, 4, 20, 16)
    p2 = jax.random.normal(k1, shape2, dtype=jnp.float32)
    t2 = jax.random.normal(k2, shape2, dtype=jnp.float32)
    m2 = (jax.random.uniform(k3, shape2) > 0.5).astype(jnp.float32)
    loss2 = jax.block_until_ready(loss_fn(p2, t2, m2))
    assert jnp.allclose(loss2, ref_loss(p2, t2, m2), rtol=1e-5, atol=1e-6)

    # 4) Multi-block streaming + even forced 2-way split (tiny tiles for test).
    shape3 = (2, 4, 16, 32)
    p3 = jax.random.normal(k1, shape3, dtype=jnp.float32)
    t3 = jax.random.normal(k2, shape3, dtype=jnp.float32)
    m3 = (jax.random.uniform(k3, shape3) > 0.5).astype(jnp.float32)
    small_fn = jax.jit(functools.partial(masked_mse_loss,
                                         _max_tile_rows=8, _force_num_splits=2))
    loss3 = jax.block_until_ready(small_fn(p3, t3, m3))
    assert jnp.allclose(loss3, ref_loss(p3, t3, m3), rtol=1e-5, atol=1e-6)

    # 5) Multi-block + partial tail where an even split is impossible (fallback).
    loss4 = jax.block_until_ready(small_fn(p2, t2, m2))
    assert jnp.allclose(loss4, ref_loss(p2, t2, m2), rtol=1e-5, atol=1e-6)

    # 6) Ragged lane tail (n % 128 != 0) -> minimal pad path.
    shape5 = (2, 3, 7, 5)
    p5 = jax.random.normal(k1, shape5, dtype=jnp.float32)
    t5 = jax.random.normal(k2, shape5, dtype=jnp.float32)
    m5 = (jax.random.uniform(k3, shape5) > 0.5).astype(jnp.float32)
    loss5 = jax.block_until_ready(loss_fn(p5, t5, m5))
    assert jnp.allclose(loss5, ref_loss(p5, t5, m5), rtol=1e-5, atol=1e-6)

    print("KERNEL_OK")
</pallas_src>

<mosaic_0001>
module attributes {stable_mosaic.version = 11 : i64} {
  func.func @_masked_mse_kernel(%arg0: i32, %arg1: i32, %arg2: memref<16x128xf32, #tpu.memory_space<vmem>>, %arg3: memref<16x128xf32, #tpu.memory_space<vmem>>, %arg4: memref<16x128xf32, #tpu.memory_space<vmem>>, %arg5: memref<8x128xf32, #tpu.memory_space<vmem>>, %arg6: memref<8x128xf32, #tpu.memory_space<vmem>>) attributes {dimension_semantics = [#tpu.dimension_semantics<parallel>, #tpu.dimension_semantics<arbitrary>], iteration_bounds = array<i64: 1, 1>, scalar_prefetch = 0 : i64, scratch_operands = 0 : i64, tpu.core_type = #tpu.core_type<tc>, window_params = [{transform_indices = @transform_0, window_bounds = array<i64: 16, 128>}, {transform_indices = @transform_1, window_bounds = array<i64: 16, 128>}, {transform_indices = @transform_2, window_bounds = array<i64: 16, 128>}, {transform_indices = @transform_3, window_bounds = array<i64: 8, 128>}, {transform_indices = @transform_4, window_bounds = array<i64: 8, 128>}]} {
    %c0_i32 = arith.constant 0 : i32
    %0 = arith.cmpi eq, %arg1, %c0_i32 : i32
    %1 = arith.extui %0 : i1 to i32
    %c0_i32_0 = arith.constant 0 : i32
    %2 = arith.cmpi ne, %1, %c0_i32_0 : i32
    scf.if %2 {
      %cst_15 = arith.constant 0.000000e+00 : f32
      %19 = vector.broadcast %cst_15 : f32 to vector<8x128xf32>
      %c0_16 = arith.constant 0 : index
      %c0_17 = arith.constant 0 : index
      %20 = vector.load %arg5[%c0_16, %c0_17] : memref<8x128xf32, #tpu.memory_space<vmem>>, vector<8x128xf32>
      tpu.vector_store %arg5[%c0_16, %c0_17], %19 {strides = array<i32>} : memref<8x128xf32, #tpu.memory_space<vmem>>, vector<8x128xf32>,
      %cst_18 = arith.constant 0.000000e+00 : f32
      %21 = vector.broadcast %cst_18 : f32 to vector<8x128xf32>
      %c0_19 = arith.constant 0 : index
      %c0_20 = arith.constant 0 : index
      %22 = vector.load %arg6[%c0_19, %c0_20] : memref<8x128xf32, #tpu.memory_space<vmem>>, vector<8x128xf32>
      tpu.vector_store %arg6[%c0_19, %c0_20], %21 {strides = array<i32>} : memref<8x128xf32, #tpu.memory_space<vmem>>, vector<8x128xf32>,
    } else {
    }
    %c0 = arith.constant 0 : index
    %c0_1 = arith.constant 0 : index
    %3 = vector.load %arg2[%c0, %c0_1] : memref<16x128xf32, #tpu.memory_space<vmem>>, vector<16x128xf32>
    %c0_2 = arith.constant 0 : index
    %c0_3 = arith.constant 0 : index
    %4 = vector.load %arg3[%c0_2, %c0_3] : memref<16x128xf32, #tpu.memory_space<vmem>>, vector<16x128xf32>
    %c0_4 = arith.constant 0 : index
    %c0_5 = arith.constant 0 : index
    %5 = vector.load %arg4[%c0_4, %c0_5] : memref<16x128xf32, #tpu.memory_space<vmem>>, vector<16x128xf32>
    %6 = arith.subf %3, %4 : vector<16x128xf32>
    %7 = arith.mulf %6, %6 : vector<16x128xf32>
    %8 = arith.mulf %7, %5 : vector<16x128xf32>
    %c0_6 = arith.constant 0 : index
    %c0_7 = arith.constant 0 : index
    %9 = vector.load %arg5[%c0_6, %c0_7] : memref<8x128xf32, #tpu.memory_space<vmem>>, vector<8x128xf32>
    %10 = vector.shape_cast %8 : vector<16x128xf32> to vector<2x8x128xf32>
    %cst = arith.constant dense<0.000000e+00> : vector<8x128xf32>
    %11 = vector.multi_reduction <add>, %10, %cst [0] : vector<2x8x128xf32> to vector<8x128xf32>
    %12 = arith.addf %9, %11 : vector<8x128xf32>
    %c0_8 = arith.constant 0 : index
    %c0_9 = arith.constant 0 : index
    %13 = vector.load %arg5[%c0_8, %c0_9] : memref<8x128xf32, #tpu.memory_space<vmem>>, vector<8x128xf32>
    tpu.vector_store %arg5[%c0_8, %c0_9], %12 {strides = array<i32>} : memref<8x128xf32, #tpu.memory_space<vmem>>, vector<8x128xf32>,
    %c0_10 = arith.constant 0 : index
    %c0_11 = arith.constant 0 : index
    %14 = vector.load %arg6[%c0_10, %c0_11] : memref<8x128xf32, #tpu.memory_space<vmem>>, vector<8x128xf32>
    %15 = vector.shape_cast %5 : vector<16x128xf32> to vector<2x8x128xf32>
    %cst_12 = arith.constant dense<0.000000e+00> : vector<8x128xf32>
    %16 = vector.multi_reduction <add>, %15, %cst_12 [0] : vector<2x8x128xf32> to vector<8x128xf32>
    %17 = arith.addf %14, %16 : vector<8x128xf32>
    %c0_13 = arith.constant 0 : index
    %c0_14 = arith.constant 0 : index
    %18 = vector.load %arg6[%c0_13, %c0_14] : memref<8x128xf32, #tpu.memory_space<vmem>>, vector<8x128xf32>
    tpu.vector_store %arg6[%c0_13, %c0_14], %17 {strides = array<i32>} : memref<8x128xf32, #tpu.memory_space<vmem>>, vector<8x128xf32>,
    return
  }
  func.func @transform_0(%arg0: i32, %arg1: i32) -> (i32, i32) {
    %c1_i32 = arith.constant 1 : i32
    %0 = arith.muli %arg0, %c1_i32 : i32
    %1 = arith.addi %0, %arg1 : i32
    %c0_i32 = arith.constant 0 : i32
    %c0_i32_0 = arith.constant 0 : i32
    return %1, %c0_i32 : i32, i32
  }
  func.func @transform_1(%arg0: i32, %arg1: i32) -> (i32, i32) {
    %c1_i32 = arith.constant 1 : i32
    %0 = arith.muli %arg0, %c1_i32 : i32
    %1 = arith.addi %0, %arg1 : i32
    %c0_i32 = arith.constant 0 : i32
    %c0_i32_0 = arith.constant 0 : i32
    return %1, %c0_i32 : i32, i32
  }
  func.func @transform_2(%arg0: i32, %arg1: i32) -> (i32, i32) {
    %c1_i32 = arith.constant 1 : i32
    %0 = arith.muli %arg0, %c1_i32 : i32
    %1 = arith.addi %0, %arg1 : i32
    %c0_i32 = arith.constant 0 : i32
    %c0_i32_0 = arith.constant 0 : i32
    return %1, %c0_i32 : i32, i32
  }
  func.func @transform_3(%arg0: i32, %arg1: i32) -> (i32, i32) {
    %c0_i32 = arith.constant 0 : i32
    %c0_i32_0 = arith.constant 0 : i32
    return %arg0, %c0_i32 : i32, i32
  }
  func.func @transform_4(%arg0: i32, %arg1: i32) -> (i32, i32) {
    %c0_i32 = arith.constant 0 : i32
    %c0_i32_0 = arith.constant 0 : i32
    return %arg0, %c0_i32 : i32, i32
  }
}

</mosaic_0001>

<bundles_post_ra>
// kernel: masked_mse_loss.1
= control target key start
LH: loop header
LB: loop body
LE: loop exit
PB: predicated region body
PF: predicated region fallthrough
CT: control target
= control target key end

     0   :  { %s184_s0 = inlined_call_operand.vmem [shape: f32[16,128], index: 0, kind: input, shape index: {}]   ;;  %s185_s1 = inlined_call_operand.vmem [shape: f32[16,128], index: 1, kind: input, shape index: {}]   ;;  %s186_s2 = inlined_call_operand.vmem [shape: f32[16,128], index: 2, kind: input, shape index: {}]   ;;  %s187_s4 = inlined_call_operand.vmem [shape: f32[8,128], index: 4, kind: output, shape index: {1}]   ;;  %s188_s3 = inlined_call_operand.vmem [shape: f32[8,128], index: 3, kind: output, shape index: {0}]  }
   0x1   :  { %v88_v0 = vld [vmem:[%s184_s0] sm:$0xff]  ;;  %v89_v1 = vld [vmem:[%s184_s0 + $0x8] sm:$0xff] }
   0x2   :  { %v90_v2 = vld [vmem:[%s185_s1] sm:$0xff]  ;;  %v91_v3 = vld [vmem:[%s185_s1 + $0x8] sm:$0xff] }
   0x3   :  { %v92_v4 = vld [vmem:[%s186_s2] sm:$0xff]  ;;  %v93_v5 = vld [vmem:[%s186_s2 + $0x8] sm:$0xff]  ;;  %v94_v6 = vsub.f32 %v88_v0, %v90_v2  ;;  %v95_v7 = vsub.f32 %v89_v1, %v91_v3 }
   0x4   :  { %v105_v8 = vadd.f32 %v93_v5, %v92_v4 }
   0x5   :  { %v96_v9 = vmul.f32 %v94_v6, %v94_v6  ;;  %v97_v10 = vmul.f32 %v95_v7, %v95_v7 }
   0x6   :  { %107 = vst [vmem:[%s187_s4] sm:$0xff] %v105_v8 }
   0x7   :  { %v98_v11 = vmul.f32 %v96_v9, %v92_v4  ;;  %v99_v12 = vmul.f32 %v97_v10, %v93_v5 }
   0x9   :  { %v101_v13 = vadd.f32 %v99_v12, %v98_v11 }
   0xb   :  { %103 = vst [vmem:[%s188_s3] sm:$0xff] %v101_v13 }

</bundles_post_ra>
